<compile_context>
chip_gen: v7x
topology: tpu7x:2x2x1
jax: 0.10.0
libtpu: 0.0.40
codegen_flags: <defaults>
</compile_context>

<pallas_src>
import functools

import jax
import jax.numpy as jnp
from jax.experimental import pallas as pl
from jax.experimental.pallas import tpu as pltpu

EPS = 1e-6


def _round_up(x, m):
    return (x + m - 1) // m * m


def _vmem_limit_bytes():
    """Pick a scoped-VMEM limit with headroom, per chip generation."""
    cap = 64 << 20
    try:
        info = pltpu.get_tpu_info()
        cap = int(getattr(info, "vmem_capacity_bytes", cap) or cap)
    except Exception:
        pass
    return int(max(32 << 20, min(cap - (8 << 20), 100 << 20)))


def _ffn_kernel(x_ref, w1_ref, b1_ref, w2_ref, b2_ref, g_ref, beta_ref,
                o_ref, acc_ref, *, d_valid):
    c = pl.program_id(1)

    @pl.when(c == 0)
    def _init():
        acc_ref[...] = jnp.zeros_like(acc_ref)

    # fc1 chunk: native-dtype operands -> MXU, f32 accumulation; bias + ReLU.
    h = jnp.dot(x_ref[...], w1_ref[...], preferred_element_type=jnp.float32)
    h = jnp.maximum(h + b1_ref[...].astype(jnp.float32), 0.0)

    # fc2 chunk accumulated into the f32 VMEM scratch.
    acc_ref[...] += jnp.dot(h.astype(w2_ref.dtype), w2_ref[...],
                            preferred_element_type=jnp.float32)

    @pl.when(c == pl.num_programs(1) - 1)
    def _finalize():
        y = acc_ref[...] + b2_ref[...].astype(jnp.float32)
        z = y + x_ref[...].astype(jnp.float32)          # residual add in f32

        d_pad = z.shape[-1]
        if d_valid == d_pad:
            mean = jnp.mean(z, axis=-1, keepdims=True)
            cent = z - mean
            var = jnp.mean(cent * cent, axis=-1, keepdims=True)
        else:
            # Feature axis was lane-padded with zeros; exclude pad lanes
            # from the LayerNorm statistics.
            inv_n = 1.0 / d_valid
            lane = jax.lax.broadcasted_iota(jnp.int32, z.shape, 1)
            mask = lane < d_valid
            mean = jnp.sum(z, axis=-1, keepdims=True) * inv_n  # pads are 0
            cent = z - mean
            cent_m = jnp.where(mask, cent, 0.0)
            var = jnp.sum(cent_m * cent_m, axis=-1, keepdims=True) * inv_n

        norm = cent * jax.lax.rsqrt(var + EPS)
        o_ref[...] = (norm * g_ref[...].astype(jnp.float32)
                      + beta_ref[...].astype(jnp.float32)).astype(o_ref.dtype)


def positionwise_feed_forward(x, w1, b1, w2, b2, gamma, beta,
                              *, tm=256, hid_chunk=512):
    """x: (B, S, d_in). Math layout weights: w1 (d_in, d_hid), w2 (d_hid, d_in)."""
    B, S, d_in = x.shape
    d_hid = w1.shape[1]
    M = B * S

    # Lane-pad the feature dim to a multiple of 128 (dense vst, full vregs).
    d_pad = _round_up(d_in, 128)

    # Chunk d_hid (128-aligned chunks); single chunk if it already fits.
    d_hid_pad = _round_up(d_hid, 128)
    if d_hid_pad <= hid_chunk:
        hid_chunk = d_hid_pad
    else:
        hid_chunk = _round_up(hid_chunk, 128)
        d_hid_pad = _round_up(d_hid_pad, hid_chunk)

    # Row tile: big by default, clamped (8-aligned) for tiny inputs.
    tm = min(tm, _round_up(M, 8))
    tm = _round_up(tm, 8)
    M_pad = _round_up(M, tm)

    def _pad2(a, pr, pc):
        return a if (pr == 0 and pc == 0) else jnp.pad(a, ((0, pr), (0, pc)))

    def _pad1(a, pc):
        return a if pc == 0 else jnp.pad(a, (0, pc))

    x2 = _pad2(x.reshape(M, d_in), M_pad - M, d_pad - d_in)
    w1p = _pad2(w1, d_pad - d_in, d_hid_pad - d_hid)
    b1p = _pad1(b1, d_hid_pad - d_hid).reshape(1, d_hid_pad)
    w2p = _pad2(w2, d_hid_pad - d_hid, d_pad - d_in)
    b2p = _pad1(b2, d_pad - d_in).reshape(1, d_pad)
    gp = _pad1(gamma, d_pad - d_in).reshape(1, d_pad)
    bp = _pad1(beta, d_pad - d_in).reshape(1, d_pad)

    grid = (M_pad // tm, d_hid_pad // hid_chunk)
    kernel = functools.partial(_ffn_kernel, d_valid=d_in)

    out = pl.pallas_call(
        kernel,
        out_shape=jax.ShapeDtypeStruct((M_pad, d_pad), x.dtype),
        grid_spec=pltpu.PrefetchScalarGridSpec(
            num_scalar_prefetch=0,
            grid=grid,
            in_specs=[
                pl.BlockSpec((tm, d_pad), lambda i, c: (i, 0)),        # x rows
                pl.BlockSpec((d_pad, hid_chunk), lambda i, c: (0, c)), # w1 chunk
                pl.BlockSpec((1, hid_chunk), lambda i, c: (0, c)),     # b1 chunk
                pl.BlockSpec((hid_chunk, d_pad), lambda i, c: (c, 0)), # w2 chunk
                pl.BlockSpec((1, d_pad), lambda i, c: (0, 0)),         # b2
                pl.BlockSpec((1, d_pad), lambda i, c: (0, 0)),         # ln gamma
                pl.BlockSpec((1, d_pad), lambda i, c: (0, 0)),         # ln beta
            ],
            out_specs=pl.BlockSpec((tm, d_pad), lambda i, c: (i, 0)),
            scratch_shapes=[pltpu.VMEM((tm, d_pad), jnp.float32)],
        ),
        compiler_params=pltpu.CompilerParams(
            dimension_semantics=("parallel", "arbitrary"),
            vmem_limit_bytes=_vmem_limit_bytes(),
        ),
    )(x2, w1p, b1p, w2p, b2p, gp, bp)

    if M_pad == M and d_pad == d_in:
        return out.reshape(B, S, d_in)
    return out[:M, :d_in].reshape(B, S, d_in)


def _reference(x, w1, b1, w2, b2, gamma, beta):
    h = jnp.maximum(x @ w1 + b1, 0.0)
    y = h @ w2 + b2
    z = y + x
    mean = jnp.mean(z, axis=-1, keepdims=True)
    var = jnp.mean((z - mean) ** 2, axis=-1, keepdims=True)
    return (z - mean) / jnp.sqrt(var + EPS) * gamma + beta


if __name__ == "__main__":
    # Small shapes consistent with the module: batch=2, seq=8, d_in=32, d_hid=64
    B, S, d_in, d_hid = 2, 8, 32, 64

    key = jax.random.PRNGKey(0)
    kx, k1, k2, k3, k4 = jax.random.split(key, 5)

    x = jax.random.normal(kx, (B, S, d_in), dtype=jnp.float32)
    w1 = jax.random.normal(k1, (d_in, d_hid), dtype=jnp.float32) * (1.0 / d_in) ** 0.5
    b1 = jax.random.normal(k2, (d_hid,), dtype=jnp.float32) * 0.01
    w2 = jax.random.normal(k3, (d_hid, d_in), dtype=jnp.float32) * (1.0 / d_hid) ** 0.5
    b2 = jax.random.normal(k4, (d_in,), dtype=jnp.float32) * 0.01
    gamma = jnp.ones((d_in,), dtype=jnp.float32)
    beta = jnp.zeros((d_in,), dtype=jnp.float32)

    out = positionwise_feed_forward(x, w1, b1, w2, b2, gamma, beta)
    out = jax.block_until_ready(out)

    ref = _reference(x, w1, b1, w2, b2, gamma, beta)
    assert out.shape == (B, S, d_in)
    assert jnp.allclose(out, ref, atol=1e-4, rtol=1e-4), "mismatch vs reference"

    print("KERNEL_OK")
</pallas_src>

<mosaic_0001>
module attributes {stable_mosaic.version = 11 : i64} {
  func.func @_ffn_kernel(%arg0: i32, %arg1: i32, %arg2: memref<16x128xf32, #tpu.memory_space<vmem>>, %arg3: memref<128x128xf32, #tpu.memory_space<vmem>>, %arg4: memref<1x128xf32, #tpu.memory_space<vmem>>, %arg5: memref<128x128xf32, #tpu.memory_space<vmem>>, %arg6: memref<1x128xf32, #tpu.memory_space<vmem>>, %arg7: memref<1x128xf32, #tpu.memory_space<vmem>>, %arg8: memref<1x128xf32, #tpu.memory_space<vmem>>, %arg9: memref<16x128xf32, #tpu.memory_space<vmem>>, %arg10: memref<16x128xf32, #tpu.memory_space<vmem>>) attributes {dimension_semantics = [#tpu.dimension_semantics<parallel>, #tpu.dimension_semantics<arbitrary>], iteration_bounds = array<i64: 1, 1>, scalar_prefetch = 0 : i64, scratch_operands = 1 : i64, tpu.core_type = #tpu.core_type<tc>, window_params = [{transform_indices = @transform_0, window_bounds = array<i64: 16, 128>}, {transform_indices = @transform_1, window_bounds = array<i64: 128, 128>}, {transform_indices = @transform_2, window_bounds = array<i64: 1, 128>}, {transform_indices = @transform_3, window_bounds = array<i64: 128, 128>}, {pipeline_mode = #tpu.pipeline_mode<synchronous>, transform_indices = @transform_4, window_bounds = array<i64: 1, 128>}, {pipeline_mode = #tpu.pipeline_mode<synchronous>, transform_indices = @transform_5, window_bounds = array<i64: 1, 128>}, {pipeline_mode = #tpu.pipeline_mode<synchronous>, transform_indices = @transform_6, window_bounds = array<i64: 1, 128>}, {transform_indices = @transform_7, window_bounds = array<i64: 16, 128>}]} {
    %c0_i32 = arith.constant 0 : i32
    %0 = arith.cmpi eq, %arg1, %c0_i32 : i32
    %1 = arith.extui %0 : i1 to i32
    %c0_i32_0 = arith.constant 0 : i32
    %2 = arith.cmpi ne, %1, %c0_i32_0 : i32
    scf.if %2 {
      %cst_16 = arith.constant 0.000000e+00 : f32
      %19 = vector.broadcast %cst_16 : f32 to vector<16x128xf32>
      %c0_17 = arith.constant 0 : index
      %c0_18 = arith.constant 0 : index
      %20 = vector.load %arg10[%c0_17, %c0_18] : memref<16x128xf32, #tpu.memory_space<vmem>>, vector<16x128xf32>
      tpu.vector_store %arg10[%c0_17, %c0_18], %19 {strides = array<i32>} : memref<16x128xf32, #tpu.memory_space<vmem>>, vector<16x128xf32>,
    } else {
    }
    %c0 = arith.constant 0 : index
    %c0_1 = arith.constant 0 : index
    %3 = vector.load %arg2[%c0, %c0_1] : memref<16x128xf32, #tpu.memory_space<vmem>>, vector<16x128xf32>
    %c0_2 = arith.constant 0 : index
    %c0_3 = arith.constant 0 : index
    %4 = vector.load %arg3[%c0_2, %c0_3] : memref<128x128xf32, #tpu.memory_space<vmem>>, vector<128x128xf32>
    %cst = arith.constant dense<0.000000e+00> : vector<16x128xf32>
    %5 = tpu.matmul %3, %4, %cst {dimension_numbers = #tpu.dot_dimension_numbers<[1], [0], [0], [1], [0, 0, 1, 1], [], []>} : vector<16x128xf32>, vector<128x128xf32>, vector<16x128xf32> -> vector<16x128xf32>
    %c0_4 = arith.constant 0 : index
    %c0_5 = arith.constant 0 : index
    %6 = vector.load %arg4[%c0_4, %c0_5] : memref<1x128xf32, #tpu.memory_space<vmem>>, vector<1x128xf32>
    %7 = vector.broadcast %6 : vector<1x128xf32> to vector<16x128xf32>
    %8 = arith.addf %5, %7 : vector<16x128xf32>
    %cst_6 = arith.constant 0.000000e+00 : f32
    %9 = vector.broadcast %cst_6 : f32 to vector<16x128xf32>
    %10 = arith.maximumf %8, %9 : vector<16x128xf32>
    %c0_7 = arith.constant 0 : index
    %c0_8 = arith.constant 0 : index
    %11 = vector.load %arg10[%c0_7, %c0_8] : memref<16x128xf32, #tpu.memory_space<vmem>>, vector<16x128xf32>
    %c0_9 = arith.constant 0 : index
    %c0_10 = arith.constant 0 : index
    %12 = vector.load %arg5[%c0_9, %c0_10] : memref<128x128xf32, #tpu.memory_space<vmem>>, vector<128x128xf32>
    %cst_11 = arith.constant dense<0.000000e+00> : vector<16x128xf32>
    %13 = tpu.matmul %10, %12, %cst_11 {dimension_numbers = #tpu.dot_dimension_numbers<[1], [0], [0], [1], [0, 0, 1, 1], [], []>} : vector<16x128xf32>, vector<128x128xf32>, vector<16x128xf32> -> vector<16x128xf32>
    %14 = arith.addf %11, %13 : vector<16x128xf32>
    %c0_12 = arith.constant 0 : index
    %c0_13 = arith.constant 0 : index
    %15 = vector.load %arg10[%c0_12, %c0_13] : memref<16x128xf32, #tpu.memory_space<vmem>>, vector<16x128xf32>
    tpu.vector_store %arg10[%c0_12, %c0_13], %14 {strides = array<i32>} : memref<16x128xf32, #tpu.memory_space<vmem>>, vector<16x128xf32>,
    %c0_i32_14 = arith.constant 0 : i32
    %16 = arith.cmpi eq, %arg1, %c0_i32_14 : i32
    %17 = arith.extui %16 : i1 to i32
    %c0_i32_15 = arith.constant 0 : i32
    %18 = arith.cmpi ne, %17, %c0_i32_15 : i32
    scf.if %18 {
      %c0_16 = arith.constant 0 : index
      %c0_17 = arith.constant 0 : index
      %19 = vector.load %arg10[%c0_16, %c0_17] : memref<16x128xf32, #tpu.memory_space<vmem>>, vector<16x128xf32>
      %c0_18 = arith.constant 0 : index
      %c0_19 = arith.constant 0 : index
      %20 = vector.load %arg6[%c0_18, %c0_19] : memref<1x128xf32, #tpu.memory_space<vmem>>, vector<1x128xf32>
      %21 = vector.broadcast %20 : vector<1x128xf32> to vector<16x128xf32>
      %22 = arith.addf %19, %21 : vector<16x128xf32>
      %c0_20 = arith.constant 0 : index
      %c0_21 = arith.constant 0 : index
      %23 = vector.load %arg2[%c0_20, %c0_21] : memref<16x128xf32, #tpu.memory_space<vmem>>, vector<16x128xf32>
      %24 = arith.addf %22, %23 : vector<16x128xf32>
      %25 = tpu.iota {dimensions = array<i32: 1>} : vector<16x128xi32>
      %c32_i32 = arith.constant 32 : i32
      %26 = vector.broadcast %c32_i32 : i32 to vector<16x128xi32>
      %27 = arith.cmpi slt, %25, %26 : vector<16x128xi32>
      %cst_22 = arith.constant dense<0.000000e+00> : vector<16xf32>
      %28 = vector.multi_reduction <add>, %24, %cst_22 [1] : vector<16x128xf32> to vector<16xf32>
      %29 = vector.shape_cast %28 : vector<16xf32> to vector<16x1xf32>
      %cst_23 = arith.constant 3.125000e-02 : f32
      %30 = vector.broadcast %cst_23 : f32 to vector<16x1xf32>
      %31 = arith.mulf %29, %30 : vector<16x1xf32>
      %32 = vector.broadcast %31 : vector<16x1xf32> to vector<16x128xf32>
      %33 = arith.subf %24, %32 : vector<16x128xf32>
      %cst_24 = arith.constant 0.000000e+00 : f32
      %34 = vector.broadcast %cst_24 : f32 to vector<16x128xf32>
      %35 = arith.select %27, %33, %34 : vector<16x128xi1>, vector<16x128xf32>
      %36 = arith.mulf %35, %35 : vector<16x128xf32>
      %cst_25 = arith.constant dense<0.000000e+00> : vector<16xf32>
      %37 = vector.multi_reduction <add>, %36, %cst_25 [1] : vector<16x128xf32> to vector<16xf32>
      %38 = vector.shape_cast %37 : vector<16xf32> to vector<16x1xf32>
      %cst_26 = arith.constant 3.125000e-02 : f32
      %39 = vector.broadcast %cst_26 : f32 to vector<16x1xf32>
      %40 = arith.mulf %38, %39 : vector<16x1xf32>
      %cst_27 = arith.constant 9.99999997E-7 : f32
      %41 = vector.broadcast %cst_27 : f32 to vector<16x1xf32>
      %42 = arith.addf %40, %41 : vector<16x1xf32>
      %43 = math.rsqrt %42 : vector<16x1xf32>
      %44 = vector.broadcast %43 : vector<16x1xf32> to vector<16x128xf32>
      %45 = arith.mulf %33, %44 : vector<16x128xf32>
      %c0_28 = arith.constant 0 : index
      %c0_29 = arith.constant 0 : index
      %46 = vector.load %arg7[%c0_28, %c0_29] : memref<1x128xf32, #tpu.memory_space<vmem>>, vector<1x128xf32>
      %47 = vector.broadcast %46 : vector<1x128xf32> to vector<16x128xf32>
      %48 = arith.mulf %45, %47 : vector<16x128xf32>
      %c0_30 = arith.constant 0 : index
      %c0_31 = arith.constant 0 : index
      %49 = vector.load %arg8[%c0_30, %c0_31] : memref<1x128xf32, #tpu.memory_space<vmem>>, vector<1x128xf32>
      %50 = vector.broadcast %49 : vector<1x128xf32> to vector<16x128xf32>
      %51 = arith.addf %48, %50 : vector<16x128xf32>
      %c0_32 = arith.constant 0 : index
      %c0_33 = arith.constant 0 : index
      %52 = vector.load %arg9[%c0_32, %c0_33] : memref<16x128xf32, #tpu.memory_space<vmem>>, vector<16x128xf32>
      tpu.vector_store %arg9[%c0_32, %c0_33], %51 {strides = array<i32>} : memref<16x128xf32, #tpu.memory_space<vmem>>, vector<16x128xf32>,
    } else {
    }
    return
  }
  func.func @transform_0(%arg0: i32, %arg1: i32) -> (i32, i32) {
    %c0_i32 = arith.constant 0 : i32
    %c0_i32_0 = arith.constant 0 : i32
    return %arg0, %c0_i32 : i32, i32
  }
  func.func @transform_1(%arg0: i32, %arg1: i32) -> (i32, i32) {
    %c0_i32 = arith.constant 0 : i32
    %c0_i32_0 = arith.constant 0 : i32
    return %c0_i32, %arg1 : i32, i32
  }
  func.func @transform_2(%arg0: i32, %arg1: i32) -> (i32, i32) {
    %c0_i32 = arith.constant 0 : i32
    %c0_i32_0 = arith.constant 0 : i32
    return %c0_i32, %arg1 : i32, i32
  }
  func.func @transform_3(%arg0: i32, %arg1: i32) -> (i32, i32) {
    %c0_i32 = arith.constant 0 : i32
    %c0_i32_0 = arith.constant 0 : i32
    return %arg1, %c0_i32 : i32, i32
  }
  func.func @transform_4(%arg0: i32, %arg1: i32) -> (i32, i32) {
    %c0_i32 = arith.constant 0 : i32
    %c0_i32_0 = arith.constant 0 : i32
    %c0_i32_1 = arith.constant 0 : i32
    return %c0_i32, %c0_i32_0 : i32, i32
  }
  func.func @transform_5(%arg0: i32, %arg1: i32) -> (i32, i32) {
    %c0_i32 = arith.constant 0 : i32
    %c0_i32_0 = arith.constant 0 : i32
    %c0_i32_1 = arith.constant 0 : i32
    return %c0_i32, %c0_i32_0 : i32, i32
  }
  func.func @transform_6(%arg0: i32, %arg1: i32) -> (i32, i32) {
    %c0_i32 = arith.constant 0 : i32
    %c0_i32_0 = arith.constant 0 : i32
    %c0_i32_1 = arith.constant 0 : i32
    return %c0_i32, %c0_i32_0 : i32, i32
  }
  func.func @transform_7(%arg0: i32, %arg1: i32) -> (i32, i32) {
    %c0_i32 = arith.constant 0 : i32
    %c0_i32_0 = arith.constant 0 : i32
    return %arg0, %c0_i32 : i32, i32
  }
}

</mosaic_0001>

<bundles_post_ra>
// kernel: tpu_custom_call.1
= control target key start
LH: loop header
LB: loop body
LE: loop exit
PB: predicated region body
PF: predicated region fallthrough
CT: control target
= control target key end

     0   :  { %12 = vsyncpa [#allocation4], 0  ;;  %s763_s0 = inlined_call_operand.hbm [shape: f32[16,128], index: 0, kind: input, shape index: {}]   ;;  %s764_s1 = inlined_call_operand.hbm [shape: f32[128,128], index: 1, kind: input, shape index: {}]   ;;  %s765_s2 = inlined_call_operand.vmem [shape: f32[1,128], index: 2, kind: input, shape index: {}]   ;;  %s766_s3 = inlined_call_operand.hbm [shape: f32[128,128], index: 3, kind: input, shape index: {}]   ;;  %s767_s4 = inlined_call_operand.vmem [shape: f32[1,128], index: 4, kind: input, shape index: {}]   ;;  %s768_s5 = inlined_call_operand.vmem [shape: f32[1,128], index: 5, kind: input, shape index: {}]   ;;  %s769_s6 = inlined_call_operand.vmem [shape: f32[1,128], index: 6, kind: input, shape index: {}]   ;;  %s770_s7 = inlined_call_operand.hbm [shape: f32[16,128], index: 7, kind: output, shape index: {}]  }
   0x1   :  { %13 = vsyncpa [#allocation7], 0 }
   0x2   :  { %14 = vsyncpa [#allocation5], 0  ;;  %s634_s24 = smov [#allocation6]   ;;  %s635_s26 = smov [#allocation3]  }
   0x3   :  { %s32_s25 = sshll.u32 %s634_s24, 4  ;;  %s20_s27 = sshll.u32 %s635_s26, 4  ;;  %s33_s25 = int_to_ptr.vmem [resolvable:$true] %s32_s25  ;;  %s680_s27 = int_to_ptr.vmem [resolvable:$true] %s20_s27 }
   0x4   :  { %s540_s30 = scalar_lea.hbm %s764_s1, 2048 }
   0x5   :  { %p541_p0 = scmp.ne.s32.totalorder %s764_s1, %s540_s30  ;;  %p544_p1 = scmp.lt.u32.totalorder %s540_s30, %s764_s1 }
   0x7   :  { %p546_p2 = pnand %p544_p1, %p541_p0 }
   0x9   :  { %549 = shalt.err (!%p546_p2)
}
   0xa   :  { %s550_s12 = scalar_lea.vmem %s33_s25, 2048  ;;  %p555_p4 = scmp.lt.s32.totalorder %s33_s25, %s33_s25 }
   0xb   :  { %p551_p3 = scmp.ne.s32.totalorder %s33_s25, %s550_s12  ;;  %p556_p5 = scmp.lt.s32.totalorder %s550_s12, %s550_s12 }
   0xd   :  { %p557_p6 = por %p556_p5, %p555_p4 }
   0xf   :  { %p558_p7 = pnand %p557_p6, %p551_p3 }
  0x11   :  { %561 = shalt.err (!%p558_p7)
}
  0x12   :  { %s636_s13 = smov 128   ;;  %s637_s14 = smov 8  }
  0x13   :  { %38 = dma.hbm_to_vmem [thread:$0]  %s764_s1, 2048, %s33_s25, [#allocation7], %s636_s13, %s636_s13, %s637_s14  }
  0x14   :  { %s562_s19 = scalar_lea.hbm %s763_s0, 256 }
  0x15   :  { %p563_p8 = scmp.ne.s32.totalorder %s763_s0, %s562_s19  ;;  %p566_p9 = scmp.lt.u32.totalorder %s562_s19, %s763_s0 }
  0x17   :  { %p568_p10 = pnand %p566_p9, %p563_p8 }
  0x19   :  { %571 = shalt.err (!%p568_p10)
}
  0x1a   :  { %s572_s24 = scalar_lea.vmem %s680_s27, 256  ;;  %p577_p12 = scmp.lt.s32.totalorder %s680_s27, %s680_s27 }
  0x1b   :  { %p573_p11 = scmp.ne.s32.totalorder %s680_s27, %s572_s24  ;;  %p578_p13 = scmp.lt.s32.totalorder %s572_s24, %s572_s24 }
  0x1d   :  { %p579_p0 = por %p578_p13, %p577_p12 }
  0x1f   :  { %p580_p1 = pnand %p579_p0, %p573_p11 }
  0x21   :  { %583 = shalt.err (!%p580_p1)
}
  0x22   :  { %26 = dma.hbm_to_vmem [thread:$0]  %s763_s0, 256, %s680_s27, [#allocation4], %s636_s13, %s636_s13, %s637_s14  }
  0x23   :  { %s638_s26 = smov [#allocation8]   ;;  %s584_s8 = scalar_lea.hbm %s766_s3, 2048 }
  0x24   :  { %s46_s28 = sshll.u32 %s638_s26, 4  ;;  %p585_p2 = scmp.ne.s32.totalorder %s766_s3, %s584_s8  ;;  %s47_s28 = int_to_ptr.vmem [resolvable:$true] %s46_s28 }
  0x25   :  { %p588_p3 = scmp.lt.u32.totalorder %s584_s8, %s766_s3 }
  0x27   :  { %p590_p4 = pnand %p588_p3, %p585_p2 }
  0x29   :  { %593 = shalt.err (!%p590_p4)
}
  0x2a   :  { %s594_s15 = scalar_lea.vmem %s47_s28, 2048  ;;  %p599_p6 = scmp.lt.s32.totalorder %s47_s28, %s47_s28 }
  0x2b   :  { %p595_p5 = scmp.ne.s32.totalorder %s47_s28, %s594_s15  ;;  %p600_p7 = scmp.lt.s32.totalorder %s594_s15, %s594_s15 }
  0x2d   :  { %p601_p8 = por %p600_p7, %p599_p6 }
  0x2f   :  { %p602_p9 = pnand %p601_p8, %p595_p5 }
  0x31   :  { %605 = shalt.err (!%p602_p9)
}
  0x32   :  { %52 = dma.hbm_to_vmem [thread:$0]  %s766_s3, 2048, %s47_s28, [#allocation7], %s636_s13, %s636_s13, %s637_s14  }
  0x33   :  { %628 = dma.done.wait [#allocation4], 256  }
  0x34   :  { %629 = vsyncadd [#allocation4], 4294967040 }
  0x35   :  { %630 = dma.done.wait [#allocation7], 4096  }
  0x36   :  { %631 = vsyncadd [#allocation7], 4294963200  ;;  %v76_v0 = vld [vmem:[#allocation6] sm:$0xff]  ;;  %v77_v1 = vld [vmem:[#allocation6 + $0x8] sm:$0xff]  ;;  %s639_s21 = smov [#allocation9]  }
  0x37   :  { %v78_v2 = vld [vmem:[#allocation6 + $0x10] sm:$0xff]  ;;  %v466_v3 = vpack.c.bf16 %v77_v1, %v76_v0  ;;  %v79_v4 = vld [vmem:[#allocation6 + $0x18] sm:$0xff]  ;;  %v80_v6 = vld [vmem:[#allocation6 + $0x20] sm:$0xff]  ;;  %v291_v0 = vlaneseq  ;;  %s343_s22 = sshll.u32 %s639_s21, 4  ;;  %s344_s22 = int_to_ptr.vmem [resolvable:$true] %s343_s22 }
  0x38   :  { %v470_v5 = vpack.c.bf16 %v79_v4, %v78_v2  ;;  %v81_v7 = vld [vmem:[#allocation6 + $0x28] sm:$0xff]  ;;  %v82_v9 = vld [vmem:[#allocation6 + $0x30] sm:$0xff]  ;;  %v83_v10 = vld [vmem:[#allocation6 + $0x38] sm:$0xff]  ;;  %s606_s23 = scalar_lea.vmem %s344_s22, 256  ;;  %p611_p11 = scmp.lt.s32.totalorder %s344_s22, %s344_s22 }
  0x39   :  { %467 = vmatprep.subr.bf16.mxu0 %v466_v3  ;;  %v474_v8 = vpack.c.bf16 %v81_v7, %v80_v6  ;;  %v732_v11 = vld [vmem:[#allocation3] sm:$0xff]  ;;  %v178_v12 = vld [vmem:[#allocation8] sm:$0xff]  ;;  %v179_v13 = vld [vmem:[#allocation8 + $0x8] sm:$0xff]  ;;  %v478_v20 = vpack.c.bf16 %v83_v10, %v82_v9  ;;  %v292_v1 = vand.u32 127, %v291_v0  ;;  %p607_p10 = scmp.ne.s32.totalorder %s344_s22, %s606_s23  ;;  %p612_p12 = scmp.lt.s32.totalorder %s606_s23, %s606_s23 }
  0x3a   :  { %469 = vmatpush3.bf16.msra.mxu0 %v466_v3  ;;  %428 = vmatprep.mubr.f32.mxu0 %v732_v11  ;;  %v180_v14 = vld [vmem:[#allocation8 + $0x10] sm:$0xff]  ;;  %v498_v15 = vpack.c.bf16 %v179_v13, %v178_v12  ;;  %v181_v16 = vld [vmem:[#allocation8 + $0x18] sm:$0xff]  ;;  %v182_v18 = vld [vmem:[#allocation8 + $0x20] sm:$0xff] }
  0x3b   :  { %471 = vmatprep.subr.bf16.mxu0 %v470_v5  ;;  %v502_v17 = vpack.c.bf16 %v181_v16, %v180_v14  ;;  %v183_v19 = vld [vmem:[#allocation8 + $0x28] sm:$0xff]  ;;  %v84_v21 = vld [vmem:[#allocation6 + $0x40] sm:$0xff]  ;;  %v184_v24 = vld [vmem:[#allocation8 + $0x30] sm:$0xff]  ;;  %vm293_vm0 = vcmp.lt.s32.totalorder %v292_v1, 32  ;;  %p613_p13 = por %p612_p12, %p611_p11 }
  0x3c   :  { %499 = vmatprep.subr.bf16.mxu1 %v498_v15  ;;  %v85_v22 = vld [vmem:[#allocation6 + $0x48] sm:$0xff]  ;;  %v506_v23 = vpack.c.bf16 %v183_v19, %v182_v18  ;;  %v185_v25 = vld [vmem:[#allocation8 + $0x38] sm:$0xff]  ;;  %v86_v27 = vld [vmem:[#allocation6 + $0x50] sm:$0xff] }
  0x3d   :  { %501 = vmatpush3.bf16.msra.mxu1 %v498_v15  ;;  %v482_v26 = vpack.c.bf16 %v85_v22, %v84_v21  ;;  %v87_v28 = vld [vmem:[#allocation6 + $0x58] sm:$0xff]  ;;  %v510_v29 = vpack.c.bf16 %v185_v25, %v184_v24  ;;  %v186_v30 = vld [vmem:[#allocation8 + $0x40] sm:$0xff]  ;;  %v187_v31 = vld [vmem:[#allocation8 + $0x48] sm:$0xff]  ;;  %p614_p0 = pnand %p613_p13, %p607_p10 }
  0x3e   :  { %473 = vmatpush3.bf16.msra.mxu0 %v470_v5  ;;  %503 = vmatprep.subr.bf16.mxu1 %v502_v17  ;;  %v486_v32 = vpack.c.bf16 %v87_v28, %v86_v27  ;;  %v88_v33 = vld [vmem:[#allocation6 + $0x60] sm:$0xff]  ;;  %v89_v34 = vld [vmem:[#allocation6 + $0x68] sm:$0xff]  ;;  %v514_v35 = vpack.c.bf16 %v187_v31, %v186_v30  ;;  %v188_v36 = vld [vmem:[#allocation8 + $0x50] sm:$0xff] }
  0x3f   :  { %475 = vmatprep.subr.bf16.mxu0 %v474_v8  ;;  %v189_v37 = vld [vmem:[#allocation8 + $0x58] sm:$0xff]  ;;  %v490_v38 = vpack.c.bf16 %v89_v34, %v88_v33  ;;  %v90_v39 = vld [vmem:[#allocation6 + $0x70] sm:$0xff]  ;;  %v190_v42 = vld [vmem:[#allocation8 + $0x60] sm:$0xff] }
  0x40   :  { %v91_v40 = vld [vmem:[#allocation6 + $0x78] sm:$0xff]  ;;  %v518_v41 = vpack.c.bf16 %v189_v37, %v188_v36  ;;  %v191_v43 = vld [vmem:[#allocation8 + $0x68] sm:$0xff]  ;;  %v192_v47 = vld [vmem:[#allocation8 + $0x70] sm:$0xff] }
  0x41   :  { %505 = vmatpush3.bf16.msra.mxu1 %v502_v17  ;;  %v494_v44 = vpack.c.bf16 %v91_v40, %v90_v39  ;;  %v522_v45 = vpack.c.bf16 %v191_v43, %v190_v42  ;;  %v75_v46 = vld [vmem:[#allocation3 + $0x8] sm:$0xff]  ;;  %v356_v50 = vld [vmem:[%s765_s2] ss:$0 sm:$0xff] }
  0x42   :  { %477 = vmatpush3.bf16.msra.mxu0 %v474_v8  ;;  %507 = vmatprep.subr.bf16.mxu1 %v506_v23  ;;  %v193_v48 = vld [vmem:[#allocation8 + $0x78] sm:$0xff]  ;;  %v357_v57 = vld [vmem:[%s767_s4] ss:$0 sm:$0xff] }
  0x43   :  { %479 = vmatprep.subr.bf16.mxu0 %v478_v20  ;;  %v526_v49 = vpack.c.bf16 %v193_v48, %v192_v47  ;;  %v358_v19 = vld [vmem:[%s768_s5] ss:$0 sm:$0xff] }
  0x44   :  { %v359_v21 = vld [vmem:[%s769_s6] ss:$0 sm:$0xff] }
  0x45   :  { %509 = vmatpush3.bf16.msra.mxu1 %v506_v23 }
  0x46   :  { %481 = vmatpush3.bf16.msra.mxu0 %v478_v20  ;;  %511 = vmatprep.subr.bf16.mxu1 %v510_v29 }
  0x47   :  { %483 = vmatprep.subr.bf16.mxu0 %v482_v26 }
  0x49   :  { %513 = vmatpush3.bf16.msra.mxu1 %v510_v29 }
  0x4a   :  { %485 = vmatpush3.bf16.msra.mxu0 %v482_v26  ;;  %515 = vmatprep.subr.bf16.mxu1 %v514_v35 }
  0x4b   :  { %487 = vmatprep.subr.bf16.mxu0 %v486_v32 }
  0x4d   :  { %517 = vmatpush3.bf16.msra.mxu1 %v514_v35 }
  0x4e   :  { %489 = vmatpush3.bf16.msra.mxu0 %v486_v32  ;;  %519 = vmatprep.subr.bf16.mxu1 %v518_v41 }
  0x4f   :  { %491 = vmatprep.subr.bf16.mxu0 %v490_v38 }
  0x51   :  { %521 = vmatpush3.bf16.msra.mxu1 %v518_v41 }
  0x52   :  { %493 = vmatpush3.bf16.msra.mxu0 %v490_v38  ;;  %523 = vmatprep.subr.bf16.mxu1 %v522_v45 }
  0x53   :  { %495 = vmatprep.subr.bf16.mxu0 %v494_v44 }
  0x55   :  { %525 = vmatpush3.bf16.msra.mxu1 %v522_v45 }
  0x56   :  { %497 = vmatpush3.bf16.msra.mxu0 %v494_v44  ;;  %527 = vmatprep.subr.bf16.mxu1 %v526_v49 }
  0x59   :  { %429 = vmatmul.mubr.f32.vlgmr.msra.gmra.mrb[0].mxu0 %v75_v46  ;;  %529 = vmatpush3.bf16.msra.mxu1 %v526_v49 }
 0x12c   :  { %v430_v51 = vpop.f32.mrb[0].mxu0 }
 0x12d   :  { %v171_v52 = vadd.f32 %v430_v51, %v356_v50  ;;  %v165_v53 = vpop.f32.mrb[1].mxu0 }
 0x12e   :  { %v166_v54 = vadd.f32 %v356_v50, %v165_v53 }
 0x12f   :  { %v175_v56 = vmax.f32 %v171_v52, 0.0 }
 0x130   :  { %v174_v55 = vmax.f32 %v166_v54, 0.0 }
 0x132   :  { %463 = vmatprep.mubr.f32.mxu1 %v174_v55 }
 0x133   :  { %464 = vmatmul.mubr.f32.vlgmr.msra.gmra.mrb[0].mxu1 %v175_v56 }
 0x206   :  { %v465_v58 = vpop.f32.mrb[0].mxu1 }
 0x207   :  { %v260_v59 = vpop.f32.mrb[1].mxu1  ;;  %v286_v61 = vadd.f32 %v465_v58, %v357_v57 }
 0x208   :  { %v285_v60 = vadd.f32 %v357_v57, %v260_v59 }
 0x209   :  { %v290_v63 = vadd.f32 %v286_v61, %v75_v46 }
 0x20a   :  { %v289_v62 = vadd.f32 %v285_v60, %v732_v11 }
 0x20c   :  { %294 = vadd.xlane.f32.xlu0 %v289_v62 }
 0x210   :  { %296 = vadd.xlane.f32.xlu0 %v290_v63 }
 0x299   :  { %v295_v2 = vpop.xlane.xlu0 %294 }
 0x29a   :  { %v298_v3 = vmul.f32 0.03125, %v295_v2 }
 0x29c   :  { %v300_v4 = vsub.f32 %v289_v62, %v298_v3 }
 0x29d   :  { %v297_v5 = vpop.xlane.xlu0 %296 }
 0x29e   :  { %v299_v6 = vmul.f32 0.03125, %v297_v5  ;;  %v302_v7 = vsel %vm293_vm0, %v300_v4, 0.0 }
 0x29f   :  { %v304_v8 = vmul.f32 %v302_v7, %v302_v7 }
 0x2a0   :  { %v301_v9 = vsub.f32 %v290_v63, %v299_v6 }
 0x2a1   :  { %306 = vadd.xlane.f32.xlu1 %v304_v8 }
 0x2a2   :  { %v303_v10 = vsel %vm293_vm0, %v301_v9, 0.0 }
 0x2a3   :  { %v305_v12 = vmul.f32 %v303_v10, %v303_v10 }
 0x2a5   :  { %308 = vadd.xlane.f32.xlu1 %v305_v12 }
 0x32e   :  { %v307_v13 = vpop.xlane.xlu1 %306 }
 0x32f   :  { %v310_v11 = vmul.f32 0.03125, %v307_v13 }
 0x331   :  { %v312_v14 = vadd.f32 1e-06, %v310_v11 }
 0x332   :  { %v309_v15 = vpop.xlane.xlu1 %308 }
 0x333   :  { %536 = vrsqrt.f32 %v312_v14  ;;  %v311_v16 = vmul.f32 0.03125, %v309_v15 }
 0x335   :  { %v313_v17 = vadd.f32 1e-06, %v311_v16 }
 0x337   :  { %538 = vrsqrt.f32 %v313_v17 }
 0x33d   :  { %v537_v18 = vpop.eup %536 }
 0x33e   :  { %v316_v20 = vmul.f32 %v537_v18, %v300_v4 }
 0x340   :  { %v325_v22 = vmul.f32 %v358_v19, %v316_v20 }
 0x341   :  { %v539_v23 = vpop.eup %538 }
 0x342   :  { %v317_v24 = vmul.f32 %v539_v23, %v301_v9  ;;  %v334_v25 = vadd.f32 %v359_v21, %v325_v22 }
 0x344   :  { %v326_v26 = vmul.f32 %v358_v19, %v317_v24  ;;  %336 = vst [vmem:[#allocation9] sm:$0xff] %v334_v25 }
 0x346   :  { %v335_v27 = vadd.f32 %v359_v21, %v326_v26 }
 0x348   :  { %337 = vst [vmem:[#allocation9 + $0x8] sm:$0xff] %v335_v27 }
 0x349   :  { %617 = shalt.err (!%p614_p0)
}
 0x34a   :  { %s618_s24 = scalar_lea.hbm %s770_s7, 256 }
 0x34b   :  { %p619_p1 = scmp.ne.s32.totalorder %s770_s7, %s618_s24  ;;  %p622_p2 = scmp.lt.u32.totalorder %s618_s24, %s770_s7 }
 0x34d   :  { %p624_p3 = pnand %p622_p2, %p619_p1 }
 0x34f   :  { %627 = shalt.err (!%p624_p3)
}
 0x350   :  { %349 = dma.vmem_to_hbm [thread:$0]  %s344_s22, 256, %s770_s7, [#allocation5], %s636_s13, %s636_s13, %s637_s14  }
 0x351   :  { %632 = dma.done.wait [#allocation5], 256  }
 0x352   :  { %633 = vsyncadd [#allocation5], 4294967040 }
 0x353   :  { %353 = vsyncpa [#allocation4], 1 }
 0x354   :  { %354 = vsyncpa [#allocation7], 1 }
 0x355   :  { %355 = vsyncpa [#allocation5], 1 }

</bundles_post_ra>
